<compile_context>
chip_gen: v6e
topology: v6e:2x2x1
jax: 0.10.0
libtpu: 0.0.40
codegen_flags: <defaults>
</compile_context>

<pallas_src>
from functools import lru_cache, partial
from typing import Dict, List, Optional

import numpy as np
import jax
import jax.numpy as jnp
from jax.experimental import pallas as pl
from jax.experimental.pallas import tpu as pltpu


# --------------------------- size-sampling helpers ---------------------------

@lru_cache
def is_power_of_two(n):
    return n > 0 and n & (n - 1) == 0


@lru_cache
def powers_of_two(min_val, max_val):
    return [2 ** i for i in range(int(min_val).bit_length() - 1,
                                  int(max_val).bit_length())]


# --------------------------- pooling matrices (host) --------------------------

@lru_cache(maxsize=None)
def _nested_matrix(size: int, n_max: int) -> np.ndarray:
    """P such that P @ registers == registers[:size] (reference only)."""
    P = np.zeros((size, n_max), dtype=np.float32)
    P[np.arange(size), np.arange(size)] = 1.0
    return P


@lru_cache(maxsize=None)
def _adaptive_avg_pool_matrix(size: int, n_max: int) -> np.ndarray:
    """P such that P @ registers == adaptive_avg_pool1d(registers.T, size).T."""
    P = np.zeros((size, n_max), dtype=np.float32)
    for i in range(size):
        start = (i * n_max) // size
        end = -((-(i + 1) * n_max) // size)  # ceil((i+1)*n_max / size)
        P[i, start:end] = 1.0 / float(end - start)
    return P


# ------------------------------ VMEM budgeting --------------------------------

_MIB = 1024 * 1024
_MAX_OUTSTANDING_DMAS = 2


@lru_cache(maxsize=1)
def _vmem_capacity_bytes() -> int:
    """Chip-aware VMEM capacity (128 MiB v5e/v6e, 64 MiB v7x); safe fallback."""
    try:
        cap = int(pltpu.get_tpu_info().vmem_capacity_bytes)
        if cap > 0:
            return cap
    except Exception:
        pass
    return 64 * _MIB  # conservative: v7x per-TensorCore VMEM


def _choose_batch_tile(batch: int, row_bytes: int):
    """Pick the batch tile (slab height) and a chip-safe vmem_limit_bytes.

    The slab is single-buffered, so target ~48 MiB of slab on 128 MiB parts
    and ~24 MiB on 64 MiB parts, leaving headroom for the (small) row-input
    double buffers and compiler scratch. tb is allowed to drop below 8 for
    very wide rows instead of silently overshooting the budget.
    """
    cap = _vmem_capacity_bytes()
    budget = min(48 * _MIB, max(4 * _MIB, cap // 2 - 8 * _MIB))
    tb = max(1, budget // max(1, row_bytes))
    if 8 <= tb < batch:
        tb = (tb // 8) * 8  # sublane-friendly when it doesn't cover the batch
    tb = min(tb, batch)
    vmem_limit = int(min(cap, max(32 * _MIB, (tb + 4) * row_bytes + 4 * _MIB)))
    return tb, vmem_limit
    # TODO(synk): if a single row (sum_k size*dim_k bytes) exceeds the budget,
    # add a lane-tiling grid axis instead of relying on tb == 1.


# ----------------------------- Pallas fan-out kernel --------------------------

def _make_fanout_kernel(n_streams: int, tb: int, batch: int, n_dma: int):
    """Fill one (tb, flat_k) VMEM slab per stream once (grid step 0), then fan
    it out to HBM with up to `n_dma` outstanding DMAs per stream.

    All output tiles are content-identical, so the final tile overlaps the
    previous one (start = batch - tb); every copy therefore has the same shape
    and semaphore byte-accounting stays uniform.
    """

    def kernel(*refs):
        rows = refs[:n_streams]                     # (1, flat_k) VMEM inputs
        outs = refs[n_streams:2 * n_streams]        # (batch, flat_k) HBM outputs
        slabs = refs[2 * n_streams:3 * n_streams]   # (tb, flat_k) VMEM scratch
        sems = refs[3 * n_streams]                  # DMA sems (n_streams, n_dma)

        i = pl.program_id(0)
        g = pl.num_programs(0)
        slot = i % n_dma
        start = jnp.minimum(i * tb, batch - tb)

        @pl.when(i == 0)
        def _():
            for k in range(n_streams):
                slabs[k][...] = jnp.broadcast_to(rows[k][...], slabs[k].shape)

        # Retire the copy issued n_dma steps ago on this slot before reuse.
        # (All copies share the same shape, so the wait descriptor only needs
        # matching sizes, not the original destination offset.)
        @pl.when(i >= n_dma)
        def _():
            for k in range(n_streams):
                pltpu.make_async_copy(
                    slabs[k], outs[k].at[pl.ds(0, tb)], sems.at[k, slot]).wait()

        for k in range(n_streams):
            pltpu.make_async_copy(
                slabs[k], outs[k].at[pl.ds(start, tb)], sems.at[k, slot]).start()

        # Drain every outstanding copy on the final grid step.
        @pl.when(i == g - 1)
        def _():
            for k in range(n_streams):
                for s in range(n_dma):
                    pltpu.make_async_copy(
                        slabs[k], outs[k].at[pl.ds(0, tb)], sems.at[k, s]).wait()

    return kernel


def _fanout_broadcast(rows, batch: int):
    """rows: tuple of (1, flat_k) arrays -> tuple of (batch, flat_k) arrays."""
    n_streams = len(rows)
    flat_dims = [int(r.shape[1]) for r in rows]
    row_bytes = sum(f * jnp.dtype(r.dtype).itemsize
                    for f, r in zip(flat_dims, rows))
    tb, vmem_limit = _choose_batch_tile(batch, row_bytes)
    grid_len = -(-batch // tb)
    n_dma = min(_MAX_OUTSTANDING_DMAS, grid_len)

    kernel = _make_fanout_kernel(n_streams, tb, batch, n_dma)

    out_shape = tuple(jax.ShapeDtypeStruct((batch, f), r.dtype)
                      for f, r in zip(flat_dims, rows))
    in_specs = [pl.BlockSpec((1, f), lambda i: (0, 0)) for f in flat_dims]
    out_specs = tuple(pl.BlockSpec(memory_space=pl.ANY) for _ in flat_dims)
    scratch_shapes = ([pltpu.VMEM((tb, f), r.dtype)
                       for f, r in zip(flat_dims, rows)]
                      + [pltpu.SemaphoreType.DMA((n_streams, n_dma))])

    outs = pl.pallas_call(
        kernel,
        out_shape=out_shape,
        grid_spec=pltpu.PrefetchScalarGridSpec(
            num_scalar_prefetch=0,
            grid=(grid_len,),
            in_specs=in_specs,
            out_specs=out_specs,
            scratch_shapes=scratch_shapes),
        compiler_params=pltpu.CompilerParams(
            # The persistent slab is filled only at step 0 -> keep the grid on
            # one core. TODO(synk): on v7x, a per-core slab fill would allow
            # ("parallel",) and use both TensorCores' DMA issue.
            dimension_semantics=("arbitrary",),
            vmem_limit_bytes=vmem_limit),
    )(*rows)
    if not isinstance(outs, (list, tuple)):
        outs = (outs,)
    return tuple(outs)


# ---------------------------- per-entry jitted path ---------------------------

@partial(jax.jit, static_argnames=("size", "batch", "ordering_mode"))
def _registers_for_entry(*tables, size: int, batch: int, ordering_mode: str):
    """Pool/slice each (n_max, d_k) table to (size, d_k) once, flatten to a
    lane-dense (1, size*d_k) row, then broadcast all streams across the batch
    in ONE Pallas call. Returns a tuple of (batch, size, d_k) arrays."""
    rows, dims = [], []
    for t in tables:
        n_max, d = t.shape
        if ordering_mode == "nested":
            reg = t[:size]  # plain slice of the table — no matmul at all
        elif ordering_mode == "avg_pool":
            P = jnp.asarray(_adaptive_avg_pool_matrix(size, n_max))
            # Tiny (size, n_max) @ (n_max, d): plain XLA matmul at HIGHEST
            # precision (exact parity with the numpy/PyTorch reference); a
            # dedicated pooling pallas_call would be pure launch overhead.
            reg = jnp.matmul(P, t.astype(jnp.float32),
                             precision=jax.lax.Precision.HIGHEST).astype(t.dtype)
        else:
            raise NotImplementedError(
                f"Ordering mode {ordering_mode} not implemented.")
        rows.append(reg.reshape(1, size * d))  # lane-dense flat row
        dims.append(d)
    outs = _fanout_broadcast(tuple(rows), batch)
    # (batch, size*d) -> (batch, size, d) is row-major compatible (free).
    return tuple(o.reshape(batch, size, d) for o, d in zip(outs, dims))


# ------------------------------- module wrapper --------------------------------

class Registers1D:
    """JAX/Pallas re-implementation of the flextok Registers1D forward pass."""

    def __init__(self,
                 input_tensor_list_read_key: str,
                 register_sizes_read_write_key: str,
                 registers_write_key: str,
                 dim: int,
                 n_min: int,
                 n_max: int,
                 n_eval: Optional[int] = None,
                 size_sampling_mode: str = "uniform",
                 ordering_mode: str = "nested",
                 extra_registers_write_key: Optional[str] = None,
                 extra_registers_dim: Optional[int] = None,
                 *,
                 key: jax.Array):
        self.input_tensor_list_read_key = input_tensor_list_read_key
        self.register_sizes_read_write_key = register_sizes_read_write_key
        self.registers_write_key = registers_write_key
        self.extra_registers_write_key = extra_registers_write_key
        self.n_min, self.n_max, self.n_eval = n_min, n_max, n_eval or n_max
        self.size_sampling_mode, self.ordering_mode = size_sampling_mode, ordering_mode
        self.training = False  # eval mode by default

        if size_sampling_mode == "powers_of_two":
            assert is_power_of_two(n_min) and is_power_of_two(n_max)
            self.valid_sizes = powers_of_two(n_min, n_max)
        elif size_sampling_mode == "uniform":
            assert n_min <= n_max
            self.valid_sizes = list(range(n_min, n_max + 1))
        elif size_sampling_mode.startswith("k="):
            self.valid_sizes = [int(k) for k in
                                size_sampling_mode.replace("k=", "").split("-")]
        else:
            raise NotImplementedError()

        # Deterministic parameter init (approximating trunc_normal_(std=0.02)).
        k1, k2 = jax.random.split(key)
        self.registers = (0.02 * jax.random.truncated_normal(
            k1, -2.0, 2.0, (n_max, dim))).astype(jnp.float32)
        if extra_registers_write_key is not None:
            assert extra_registers_dim is not None
            self.extra_registers = (0.02 * jax.random.truncated_normal(
                k2, -2.0, 2.0, (n_max, extra_registers_dim))).astype(jnp.float32)
        else:
            self.extra_registers = None

    # TODO(synk): training-time random size sampling stays host-side numpy,
    # matching the PyTorch reference (np.random.choice).
    def sample_register_sizes(self, N: int) -> np.ndarray:
        if self.training:
            return np.random.choice(self.valid_sizes, N)
        return self.n_eval * np.ones(N, dtype=np.int64)

    def get_registers(self,
                      register_sizes_list,
                      batch_sizes_list,
                      registers: jnp.ndarray) -> List[jnp.ndarray]:
        return [
            _registers_for_entry(registers, size=int(s), batch=int(b),
                                 ordering_mode=self.ordering_mode)[0]
            for s, b in zip(register_sizes_list, batch_sizes_list)
        ]

    def forward(self, data_dict: dict) -> dict:
        x_list = data_dict[self.input_tensor_list_read_key]
        batch_sizes = [int(x.shape[0]) for x in x_list]
        if self.register_sizes_read_write_key in data_dict:
            register_sizes_list = data_dict[self.register_sizes_read_write_key]
        else:
            register_sizes_list = self.sample_register_sizes(len(x_list))
            data_dict[self.register_sizes_read_write_key] = register_sizes_list

        tables = [self.registers]
        if self.extra_registers is not None:
            tables.append(self.extra_registers)

        # One fused pallas_call broadcasts main + extra registers together;
        # entries with identical (size, batch) reuse the same immutable arrays.
        cache: Dict[tuple, tuple] = {}
        results: List[List[jnp.ndarray]] = [[] for _ in tables]
        for s, b in zip(register_sizes_list, batch_sizes):
            key_ = (int(s), int(b))
            if key_ not in cache:
                cache[key_] = _registers_for_entry(
                    *tables, size=int(s), batch=int(b),
                    ordering_mode=self.ordering_mode)
            for t_idx, out in enumerate(cache[key_]):
                results[t_idx].append(out)
        # TODO(synk): entries sharing the same size but different batches could
        # additionally be concatenated along the batch axis into one call.

        data_dict[self.registers_write_key] = results[0]
        if self.extra_registers_write_key is not None:
            data_dict[self.extra_registers_write_key] = results[1]
        return data_dict

    __call__ = forward


# ------------------------------- reference + test ------------------------------

def _ref_registers(P: np.ndarray, registers: np.ndarray, batch: int) -> np.ndarray:
    reg = P @ np.asarray(registers)
    return np.broadcast_to(reg, (batch,) + reg.shape)


if __name__ == "__main__":
    key = jax.random.PRNGKey(0)
    kmod, kx1, kx2 = jax.random.split(key, 3)

    DIM, N_MIN, N_MAX, EXTRA_DIM = 32, 2, 8, 16
    module = Registers1D(
        input_tensor_list_read_key="inputs",
        register_sizes_read_write_key="register_sizes",
        registers_write_key="registers",
        dim=DIM, n_min=N_MIN, n_max=N_MAX, n_eval=N_MAX,
        size_sampling_mode="uniform",
        ordering_mode="avg_pool",
        extra_registers_write_key="extra_registers",
        extra_registers_dim=EXTRA_DIM,
        key=kmod,
    )

    # Small example inputs: only batch sizes matter for the forward pass.
    x1 = jax.random.normal(kx1, (2, 8, 32), dtype=jnp.float32)
    x2 = jax.random.normal(kx2, (3, 8, 32), dtype=jnp.float32)

    # Path without register_sizes provided (uses n_eval).
    out = module({"inputs": [x1, x2]})
    for r in out["registers"] + out["extra_registers"]:
        jax.block_until_ready(r)
    assert out["registers"][0].shape == (2, N_MAX, DIM)
    assert out["extra_registers"][1].shape == (3, N_MAX, EXTRA_DIM)

    # Correctness check against a pure-numpy reference for both modes.
    for ordering in ("avg_pool", "nested"):
        module.ordering_mode = ordering
        out = module({"inputs": [x1, x2], "register_sizes": [4, 8]})
        for size, x, got, got_extra in zip([4, 8], [x1, x2],
                                           out["registers"],
                                           out["extra_registers"]):
            if ordering == "nested":
                P = _nested_matrix(size, N_MAX)
            else:
                P = _adaptive_avg_pool_matrix(size, N_MAX)
            want = _ref_registers(P, module.registers, x.shape[0])
            want_extra = _ref_registers(P, module.extra_registers, x.shape[0])
            got = jax.block_until_ready(got)
            got_extra = jax.block_until_ready(got_extra)
            assert got.shape == (x.shape[0], size, DIM), got.shape
            assert got_extra.shape == (x.shape[0], size, EXTRA_DIM), got_extra.shape
            np.testing.assert_allclose(np.asarray(got), want, rtol=1e-5, atol=1e-6)
            np.testing.assert_allclose(np.asarray(got_extra), want_extra,
                                       rtol=1e-5, atol=1e-6)

    print("KERNEL_OK")
</pallas_src>

<mosaic_0001>
module attributes {stable_mosaic.version = 11 : i64} {
  func.func @kernel(%arg0: i32, %arg1: memref<1x256xf32, #tpu.memory_space<vmem>>, %arg2: memref<1x128xf32, #tpu.memory_space<vmem>>, %arg3: memref<2x256xf32, #tpu.memory_space<any>>, %arg4: memref<2x128xf32, #tpu.memory_space<any>>, %arg5: memref<2x256xf32, #tpu.memory_space<vmem>>, %arg6: memref<2x128xf32, #tpu.memory_space<vmem>>, %arg7: memref<2x1x!tpu.dma_semaphore, #tpu.memory_space<semaphore_mem>>) attributes {dimension_semantics = [#tpu.dimension_semantics<arbitrary>], iteration_bounds = array<i64: 1>, scalar_prefetch = 0 : i64, scratch_operands = 3 : i64, tpu.core_type = #tpu.core_type<tc>, window_params = [{pipeline_mode = #tpu.pipeline_mode<synchronous>, transform_indices = @transform_0, window_bounds = array<i64: 1, 256>}, {pipeline_mode = #tpu.pipeline_mode<synchronous>, transform_indices = @transform_1, window_bounds = array<i64: 1, 128>}, {}, {}]} {
    %c1_i32 = arith.constant 1 : i32
    %c0_i32 = arith.constant 0 : i32
    %0 = arith.cmpi eq, %c1_i32, %c0_i32 : i32
    %c1_i32_0 = arith.constant 1 : i32
    %1 = arith.select %0, %c1_i32_0, %c1_i32 : i32
    %2 = arith.remsi %arg0, %1 : i32
    %c0_i32_1 = arith.constant 0 : i32
    %3 = arith.cmpi ne, %2, %c0_i32_1 : i32
    %c0_i32_2 = arith.constant 0 : i32
    %4 = arith.cmpi slt, %2, %c0_i32_2 : i32
    %c0_i32_3 = arith.constant 0 : i32
    %5 = arith.cmpi slt, %1, %c0_i32_3 : i32
    %6 = arith.xori %4, %5 : i1
    %7 = arith.andi %6, %3 : i1
    %8 = arith.addi %2, %1 : i32
    %9 = arith.select %7, %8, %2 : i32
    %c2_i32 = arith.constant 2 : i32
    %10 = arith.muli %arg0, %c2_i32 : i32
    %c0_i32_4 = arith.constant 0 : i32
    %11 = arith.minsi %10, %c0_i32_4 : i32
    %c0_i32_5 = arith.constant 0 : i32
    %12 = arith.cmpi eq, %arg0, %c0_i32_5 : i32
    %13 = arith.extui %12 : i1 to i32
    %c0_i32_6 = arith.constant 0 : i32
    %14 = arith.cmpi ne, %13, %c0_i32_6 : i32
    scf.if %14 {
      %c0 = arith.constant 0 : index
      %c0_15 = arith.constant 0 : index
      %27 = vector.load %arg1[%c0, %c0_15] : memref<1x256xf32, #tpu.memory_space<vmem>>, vector<1x256xf32>
      %28 = vector.shape_cast %27 : vector<1x256xf32> to vector<1x256xf32>
      %29 = vector.broadcast %28 : vector<1x256xf32> to vector<2x256xf32>
      %c0_16 = arith.constant 0 : index
      %c0_17 = arith.constant 0 : index
      %30 = vector.load %arg5[%c0_16, %c0_17] : memref<2x256xf32, #tpu.memory_space<vmem>>, vector<2x256xf32>
      tpu.vector_store %arg5[%c0_16, %c0_17], %29 {strides = array<i32>} : memref<2x256xf32, #tpu.memory_space<vmem>>, vector<2x256xf32>,
      %c0_18 = arith.constant 0 : index
      %c0_19 = arith.constant 0 : index
      %31 = vector.load %arg2[%c0_18, %c0_19] : memref<1x128xf32, #tpu.memory_space<vmem>>, vector<1x128xf32>
      %32 = vector.shape_cast %31 : vector<1x128xf32> to vector<1x128xf32>
      %33 = vector.broadcast %32 : vector<1x128xf32> to vector<2x128xf32>
      %c0_20 = arith.constant 0 : index
      %c0_21 = arith.constant 0 : index
      %34 = vector.load %arg6[%c0_20, %c0_21] : memref<2x128xf32, #tpu.memory_space<vmem>>, vector<2x128xf32>
      tpu.vector_store %arg6[%c0_20, %c0_21], %33 {strides = array<i32>} : memref<2x128xf32, #tpu.memory_space<vmem>>, vector<2x128xf32>,
    } else {
    }
    %c1_i32_7 = arith.constant 1 : i32
    %15 = arith.cmpi sge, %arg0, %c1_i32_7 : i32
    %16 = arith.extui %15 : i1 to i32
    %c0_i32_8 = arith.constant 0 : i32
    %17 = arith.cmpi ne, %16, %c0_i32_8 : i32
    scf.if %17 {
      %c0_i32_15 = arith.constant 0 : i32
      %c0_i32_16 = arith.constant 0 : i32
      %c0_i32_17 = arith.constant 0 : i32
      %27 = tpu.memref_slice %arg3[%c0_i32_16, %c0_i32_17] : memref<2x256xf32, #tpu.memory_space<any>> -> memref<2x256xf32, #tpu.memory_space<any>>
      %28 = tpu.memref_slice %arg7[%c0_i32_15, %9] : memref<2x1x!tpu.dma_semaphore, #tpu.memory_space<semaphore_mem>> -> memref<1x1x!tpu.dma_semaphore, #tpu.memory_space<semaphore_mem>>
      %29 = tpu.memref_squeeze %28 : memref<1x1x!tpu.dma_semaphore, #tpu.memory_space<semaphore_mem>> -> memref<!tpu.dma_semaphore, #tpu.memory_space<semaphore_mem>>
      tpu.wait_dma2 semaphore(%29 : memref<!tpu.dma_semaphore, #tpu.memory_space<semaphore_mem>>) src(%arg5 : memref<2x256xf32, #tpu.memory_space<vmem>>) dst(%27 : memref<2x256xf32, #tpu.memory_space<any>>)
      %c1_i32_18 = arith.constant 1 : i32
      %c0_i32_19 = arith.constant 0 : i32
      %c0_i32_20 = arith.constant 0 : i32
      %30 = tpu.memref_slice %arg4[%c0_i32_19, %c0_i32_20] : memref<2x128xf32, #tpu.memory_space<any>> -> memref<2x128xf32, #tpu.memory_space<any>>
      %31 = tpu.memref_slice %arg7[%c1_i32_18, %9] : memref<2x1x!tpu.dma_semaphore, #tpu.memory_space<semaphore_mem>> -> memref<1x1x!tpu.dma_semaphore, #tpu.memory_space<semaphore_mem>>
      %32 = tpu.memref_squeeze %31 : memref<1x1x!tpu.dma_semaphore, #tpu.memory_space<semaphore_mem>> -> memref<!tpu.dma_semaphore, #tpu.memory_space<semaphore_mem>>
      tpu.wait_dma2 semaphore(%32 : memref<!tpu.dma_semaphore, #tpu.memory_space<semaphore_mem>>) src(%arg6 : memref<2x128xf32, #tpu.memory_space<vmem>>) dst(%30 : memref<2x128xf32, #tpu.memory_space<any>>)
    } else {
    }
    %c0_i32_9 = arith.constant 0 : i32
    %c0_i32_10 = arith.constant 0 : i32
    %18 = tpu.memref_slice %arg3[%11, %c0_i32_10] : memref<2x256xf32, #tpu.memory_space<any>> -> memref<2x256xf32, #tpu.memory_space<any>>
    %19 = tpu.memref_slice %arg7[%c0_i32_9, %9] : memref<2x1x!tpu.dma_semaphore, #tpu.memory_space<semaphore_mem>> -> memref<1x1x!tpu.dma_semaphore, #tpu.memory_space<semaphore_mem>>
    %20 = tpu.memref_squeeze %19 : memref<1x1x!tpu.dma_semaphore, #tpu.memory_space<semaphore_mem>> -> memref<!tpu.dma_semaphore, #tpu.memory_space<semaphore_mem>>
    tpu.enqueue_dma source(%arg5 : memref<2x256xf32, #tpu.memory_space<vmem>>) target(%18 : memref<2x256xf32, #tpu.memory_space<any>>) target_semaphore(%20 : memref<!tpu.dma_semaphore, #tpu.memory_space<semaphore_mem>>)
    %c1_i32_11 = arith.constant 1 : i32
    %c0_i32_12 = arith.constant 0 : i32
    %21 = tpu.memref_slice %arg4[%11, %c0_i32_12] : memref<2x128xf32, #tpu.memory_space<any>> -> memref<2x128xf32, #tpu.memory_space<any>>
    %22 = tpu.memref_slice %arg7[%c1_i32_11, %9] : memref<2x1x!tpu.dma_semaphore, #tpu.memory_space<semaphore_mem>> -> memref<1x1x!tpu.dma_semaphore, #tpu.memory_space<semaphore_mem>>
    %23 = tpu.memref_squeeze %22 : memref<1x1x!tpu.dma_semaphore, #tpu.memory_space<semaphore_mem>> -> memref<!tpu.dma_semaphore, #tpu.memory_space<semaphore_mem>>
    tpu.enqueue_dma source(%arg6 : memref<2x128xf32, #tpu.memory_space<vmem>>) target(%21 : memref<2x128xf32, #tpu.memory_space<any>>) target_semaphore(%23 : memref<!tpu.dma_semaphore, #tpu.memory_space<semaphore_mem>>)
    %c0_i32_13 = arith.constant 0 : i32
    %24 = arith.cmpi eq, %arg0, %c0_i32_13 : i32
    %25 = arith.extui %24 : i1 to i32
    %c0_i32_14 = arith.constant 0 : i32
    %26 = arith.cmpi ne, %25, %c0_i32_14 : i32
    scf.if %26 {
      %c0_i32_15 = arith.constant 0 : i32
      %c0_i32_16 = arith.constant 0 : i32
      %c0_i32_17 = arith.constant 0 : i32
      %c0_i32_18 = arith.constant 0 : i32
      %27 = tpu.memref_slice %arg3[%c0_i32_17, %c0_i32_18] : memref<2x256xf32, #tpu.memory_space<any>> -> memref<2x256xf32, #tpu.memory_space<any>>
      %28 = tpu.memref_slice %arg7[%c0_i32_15, %c0_i32_16] : memref<2x1x!tpu.dma_semaphore, #tpu.memory_space<semaphore_mem>> -> memref<1x1x!tpu.dma_semaphore, #tpu.memory_space<semaphore_mem>>
      %29 = tpu.memref_squeeze %28 : memref<1x1x!tpu.dma_semaphore, #tpu.memory_space<semaphore_mem>> -> memref<!tpu.dma_semaphore, #tpu.memory_space<semaphore_mem>>
      tpu.wait_dma2 semaphore(%29 : memref<!tpu.dma_semaphore, #tpu.memory_space<semaphore_mem>>) src(%arg5 : memref<2x256xf32, #tpu.memory_space<vmem>>) dst(%27 : memref<2x256xf32, #tpu.memory_space<any>>)
      %c1_i32_19 = arith.constant 1 : i32
      %c0_i32_20 = arith.constant 0 : i32
      %c0_i32_21 = arith.constant 0 : i32
      %c0_i32_22 = arith.constant 0 : i32
      %30 = tpu.memref_slice %arg4[%c0_i32_21, %c0_i32_22] : memref<2x128xf32, #tpu.memory_space<any>> -> memref<2x128xf32, #tpu.memory_space<any>>
      %31 = tpu.memref_slice %arg7[%c1_i32_19, %c0_i32_20] : memref<2x1x!tpu.dma_semaphore, #tpu.memory_space<semaphore_mem>> -> memref<1x1x!tpu.dma_semaphore, #tpu.memory_space<semaphore_mem>>
      %32 = tpu.memref_squeeze %31 : memref<1x1x!tpu.dma_semaphore, #tpu.memory_space<semaphore_mem>> -> memref<!tpu.dma_semaphore, #tpu.memory_space<semaphore_mem>>
      tpu.wait_dma2 semaphore(%32 : memref<!tpu.dma_semaphore, #tpu.memory_space<semaphore_mem>>) src(%arg6 : memref<2x128xf32, #tpu.memory_space<vmem>>) dst(%30 : memref<2x128xf32, #tpu.memory_space<any>>)
    } else {
    }
    return
  }
  func.func @transform_0(%arg0: i32) -> (i32, i32) {
    %c0_i32 = arith.constant 0 : i32
    %c0_i32_0 = arith.constant 0 : i32
    %c0_i32_1 = arith.constant 0 : i32
    return %c0_i32, %c0_i32_0 : i32, i32
  }
  func.func @transform_1(%arg0: i32) -> (i32, i32) {
    %c0_i32 = arith.constant 0 : i32
    %c0_i32_0 = arith.constant 0 : i32
    %c0_i32_1 = arith.constant 0 : i32
    return %c0_i32, %c0_i32_0 : i32, i32
  }
}

</mosaic_0001>

<bundles_post_ra>
// kernel: _registers_for_entry.1
= control target key start
LH: loop header
LB: loop body
LE: loop exit
PB: predicated region body
PF: predicated region fallthrough
CT: control target
= control target key end

     0   :  { %v22_v0 = vlaneseq  ;;  %s243_s0 = inlined_call_operand.vmem [shape: f32[1,256], index: 0, kind: input, shape index: {}]   ;;  %s244_s3 = inlined_call_operand.vmem [shape: f32[2,128], index: 3, kind: output, shape index: {1}]   ;;  %s245_s1 = inlined_call_operand.vmem [shape: f32[1,128], index: 1, kind: input, shape index: {}]   ;;  %s246_s2 = inlined_call_operand.vmem [shape: f32[2,256], index: 2, kind: output, shape index: {0}]  }
   0x1   :  { %v204_v1 = vld [vmem:[%s245_s1] ss:$0 sm:$0xff] }
   0x2   :  { %v23_v2 = vshrl.u32 %v22_v0, 7  ;;  %47 = vst [vmem:[#allocation3] sm:$0x3] %v204_v1  ;;  %v20_v3 = vld [vmem:[%s243_s0] sm:$0x3] }
   0x4   :  { %v24_v4 = vsub.s32 0, %v23_v2  ;;  %v28_v5 = vsub.s32 1, %v23_v2 }
   0x6   :  { %v25_v6 = vrot.slane %v20_v3, %v24_v4  ;;  %v29_v7 = vrot.slane %v20_v3, %v28_v5 }
   0x8   :  { %v30_v8 = vcombine.low %v25_v6, %v29_v7 }
   0xa   :  { %203 = vst.sshfl [vmem:[#allocation2] sm:$0x33 pattern:$0x76325410] %v30_v8 }
  0x11   :  { %v82_v9 = vld [vmem:[#allocation2] sm:$0xf] }
  0x12   :  { %83 = vst [vmem:[%s246_s2] sm:$0xf] %v82_v9 }
  0x13   :  { %109 = vsyncadd [#allocation4], 64  ;;  %v130_v10 = vld [vmem:[#allocation3] sm:$0x3] }
  0x14   :  { %131 = vst [vmem:[%s244_s3] sm:$0x3] %v130_v10 }
  0x15   :  { %157 = vsyncadd [#allocation4 + $0x1], 32 }
  0x16   :  { %207 = dma.done.wait [#allocation4], 64 }
  0x17   :  { %208 = vsyncadd [#allocation4], 4294967232 }
  0x18   :  { %209 = dma.done.wait [#allocation4 + $0x1], 32 }
  0x19   :  { %210 = vsyncadd [#allocation4 + $0x1], 4294967264 }
  0x1a   :  { %167 = vsyncmov [#allocation4] }
  0x1d   :  { %s168_s0 = vpop.sfrf %167 }
  0x1e   :  { %p205_p0 = scmp.ne.s32.totalorder %s168_s0, 0 }
  0x20   :  { %172 = shalt.err (%p205_p0)  }
  0x21   :  { %174 = vsyncmov [#allocation4 + $0x1] }
  0x24   :  { %s175_s19 = vpop.sfrf %174 }
  0x25   :  { %p206_p1 = scmp.ne.s32.totalorder %s175_s19, 0 }
  0x27   :  { %179 = shalt.err (%p206_p1)  }

</bundles_post_ra>
